<compile_context>
chip_gen: v6e
topology: v6e:2x2x1
jax: 0.10.0
libtpu: 0.0.40
codegen_flags: <defaults>
</compile_context>

<pallas_src>
import functools

import jax
import jax.numpy as jnp
from jax.experimental import pallas as pl
from jax.experimental.pallas import tpu as pltpu

LN_EPS = 1e-5  # PyTorch nn.LayerNorm default


def _patch_embed_ln_kernel(x_ref, w_ref, b_ref, g_ref, beta_ref, o_ref):
    # x_ref:    (TM, K)  mxu dtype (bf16 by default), streamed per grid step
    # w_ref:    (K, D)   mxu dtype, VMEM-resident across the grid
    # b_ref:    (1, D)   f32 conv bias
    # g_ref:    (1, D)   f32 LayerNorm gamma
    # beta_ref: (1, D)   f32 LayerNorm beta
    # o_ref:    (TM, D)  output tile
    y = jnp.dot(x_ref[...], w_ref[...], preferred_element_type=jnp.float32)
    y = y + b_ref[...]

    # Single-pass LayerNorm statistics in f32: var = E[y^2] - E[y]^2.
    # One fewer full (TM, D) pass than mean -> center -> square.
    mean = jnp.mean(y, axis=-1, keepdims=True)
    mean_sq = jnp.mean(y * y, axis=-1, keepdims=True)
    var = mean_sq - mean * mean
    inv = jax.lax.rsqrt(var + LN_EPS)
    o_ref[...] = ((y - mean) * inv * g_ref[...] + beta_ref[...]).astype(o_ref.dtype)


def _default_tm():
    # v5e: 16 MiB default scoped VMEM and compute-bound here -> 512.
    # v6e/v7x: 32 MiB default scoped VMEM; bf16-in/bf16-out at TM=1024 fits with
    # double-buffered x/out tiles + resident W + f32 LN temps -> 1024.
    try:
        kind = jax.devices()[0].device_kind.lower()
    except Exception:
        return 512
    if any(v in kind for v in ("v2", "v3", "v4", "v5")):
        return 512
    return 1024


@functools.partial(
    jax.jit,
    static_argnames=("patch_size", "tm", "mxu_dtype", "out_dtype", "vmem_limit_bytes"),
)
def patch_embed_generic(
    x,
    conv_w,
    conv_b,
    ln_gamma,
    ln_beta,
    *,
    patch_size,
    tm=None,                   # None -> per-generation default (512 v5e, 1024 v6e/v7x)
    mxu_dtype=jnp.bfloat16,    # bf16 MXU inputs, f32 accumulation
    out_dtype=None,            # None -> mxu_dtype (bf16 writeback by default)
    vmem_limit_bytes=None,
):
    """x: (B, C, H, W) NCHW, matching PyTorch.  Returns (B, N, D)."""
    B, C, H, W = x.shape
    D = conv_w.shape[0]
    p = patch_size
    assert H % p == 0 and W % p == 0
    nh, nw = H // p, W // p
    N = nh * nw
    M = B * N
    K0 = C * p * p
    mxu_dtype = jnp.dtype(mxu_dtype)
    out_dtype = mxu_dtype if out_dtype is None else jnp.dtype(out_dtype)
    if tm is None:
        tm = _default_tm()

    # --- patch extraction: (B, C, H, W) -> (M, K), K flattened in (C, ph, pw)
    # order.  Left as one standalone XLA rearrange+cast pass (read f32 once,
    # write bf16 once) rather than fused into the kernel's per-block DMA.
    patches = x.reshape(B, C, nh, p, nw, p)
    patches = patches.transpose(0, 2, 4, 1, 3, 5).reshape(M, K0)
    patches = patches.astype(mxu_dtype)

    # conv weight (D, C, p, p) -> (K, D), matching the patch flattening order.
    # TODO(synk): accept a pre-transposed/cast (K, D) weight from model init to
    # skip this tiny per-call transpose.
    w_mat = conv_w.reshape(D, K0).T.astype(mxu_dtype)

    # Pad ragged K up to a multiple of 128 (keeps the MXU lanes full on v5e and
    # the reads lane-aligned); zero rows/cols are exact no-ops in the matmul.
    k_pad = (-K0) % 128
    if k_pad:
        patches = jnp.pad(patches, ((0, 0), (0, k_pad)))
        w_mat = jnp.pad(w_mat, ((0, k_pad), (0, 0)))
    K = K0 + k_pad

    # --- M tiling.  No padding of M: Pallas handles the partial last block
    # (masked output stores; garbage OOB input rows only affect dropped rows
    # because LN reduces per-row).  Cap tm_eff at ~cdiv(M,2) so there are >= 2
    # grid steps for v7x's two TensorCores whenever M allows it.
    tm_cap = max(8, (tm // 8) * 8)
    half_m = pl.cdiv(M, 2)
    if half_m >= 128:
        half_m = pl.cdiv(half_m, 128) * 128
    else:
        half_m = pl.cdiv(half_m, 8) * 8
    tm_eff = max(8, min(tm_cap, half_m))
    grid_m = pl.cdiv(M, tm_eff)

    out_flat = pl.pallas_call(
        _patch_embed_ln_kernel,
        out_shape=jax.ShapeDtypeStruct((M, D), out_dtype),
        grid=(grid_m,),
        in_specs=[
            pl.BlockSpec((tm_eff, K), lambda i: (i, 0)),   # streamed patch rows
            pl.BlockSpec((K, D), lambda i: (0, 0)),        # resident weight
            pl.BlockSpec((1, D), lambda i: (0, 0)),        # resident bias
            pl.BlockSpec((1, D), lambda i: (0, 0)),        # resident gamma
            pl.BlockSpec((1, D), lambda i: (0, 0)),        # resident beta
        ],
        out_specs=pl.BlockSpec((tm_eff, D), lambda i: (i, 0)),
        compiler_params=pltpu.CompilerParams(
            # Rows are independent -> megacore-shardable on v7x.
            dimension_semantics=("parallel",),
            vmem_limit_bytes=vmem_limit_bytes,
        ),
    )(
        patches,
        w_mat,
        conv_b.reshape(1, D).astype(jnp.float32),
        ln_gamma.reshape(1, D).astype(jnp.float32),
        ln_beta.reshape(1, D).astype(jnp.float32),
    )

    # flatten(2).transpose(1, 2) semantics: rows are already ordered (b, i, j).
    return out_flat.reshape(B, N, D)


def _reference(x, conv_w, conv_b, ln_gamma, ln_beta, patch_size):
    """Pure-JAX f32 reference replicating the PyTorch forward exactly."""
    y = jax.lax.conv_general_dilated(
        x, conv_w,
        window_strides=(patch_size, patch_size),
        padding="VALID",
        dimension_numbers=("NCHW", "OIHW", "NCHW"),
    ) + conv_b[None, :, None, None]
    B, D, nh, nw = y.shape
    y = y.reshape(B, D, nh * nw).transpose(0, 2, 1)          # (B, N, D)
    mean = jnp.mean(y, axis=-1, keepdims=True)
    var = jnp.mean((y - mean) ** 2, axis=-1, keepdims=True)
    return (y - mean) * jax.lax.rsqrt(var + LN_EPS) * ln_gamma + ln_beta


if __name__ == "__main__":
    key = jax.random.PRNGKey(0)
    kx, kw, kb, kg, kbeta, kx2 = jax.random.split(key, 6)

    # --- small shapes consistent with the module's forward ---
    B, C, H, W = 2, 4, 16, 16
    patch = 8
    embed_dim = 32

    x = jax.random.normal(kx, (B, C, H, W), dtype=jnp.float32)
    conv_w = jax.random.normal(kw, (embed_dim, C, patch, patch),
                               dtype=jnp.float32) * 0.02
    conv_b = jax.random.normal(kb, (embed_dim,), dtype=jnp.float32) * 0.02
    ln_gamma = jnp.ones((embed_dim,), dtype=jnp.float32) \
        + 0.01 * jax.random.normal(kg, (embed_dim,), dtype=jnp.float32)
    ln_beta = 0.01 * jax.random.normal(kbeta, (embed_dim,), dtype=jnp.float32)

    ref = _reference(x, conv_w, conv_b, ln_gamma, ln_beta, patch)

    # 1) default path: bf16 MXU inputs, bf16 output, f32 accumulation/LN
    out = patch_embed_generic(x, conv_w, conv_b, ln_gamma, ln_beta,
                              patch_size=patch)
    out = jax.block_until_ready(out)
    assert out.shape == (B, (H // patch) * (W // patch), embed_dim)
    assert out.dtype == jnp.bfloat16
    assert jnp.allclose(out.astype(jnp.float32), ref, atol=2e-2, rtol=2e-2)

    # 2) f32-MXU / f32-out path, tight tolerance (numerical equivalence check)
    out_f32 = patch_embed_generic(x, conv_w, conv_b, ln_gamma, ln_beta,
                                  patch_size=patch, mxu_dtype=jnp.float32)
    out_f32 = jax.block_until_ready(out_f32)
    assert out_f32.dtype == jnp.float32
    assert jnp.allclose(out_f32, ref, atol=1e-4, rtol=1e-4)

    # 3) multi-step grid + ragged tail (no jnp.pad path anymore):
    #    H=W=40, p=8 -> N=25/image, M=50.
    H2 = W2 = 40
    x2 = jax.random.normal(kx2, (B, C, H2, W2), dtype=jnp.float32)
    ref2 = _reference(x2, conv_w, conv_b, ln_gamma, ln_beta, patch)

    # default tm: tm_eff capped to ~cdiv(M,2)=32 -> grid=(2,), last block ragged
    out2 = patch_embed_generic(x2, conv_w, conv_b, ln_gamma, ln_beta,
                               patch_size=patch)
    out2 = jax.block_until_ready(out2)
    assert out2.shape == (B, 25, embed_dim)
    assert jnp.allclose(out2.astype(jnp.float32), ref2, atol=2e-2, rtol=2e-2)

    # tiny tiles: grid=(7,) with a 2-row valid tail block (masked stores)
    out3 = patch_embed_generic(x2, conv_w, conv_b, ln_gamma, ln_beta,
                               patch_size=patch, tm=8)
    out3 = jax.block_until_ready(out3)
    assert jnp.allclose(out3.astype(jnp.float32), ref2, atol=2e-2, rtol=2e-2)

    # ragged tail with the f32 path, tight tolerance (asserts the masked-tail
    # handling is exact for the kept rows)
    out3_f32 = patch_embed_generic(x2, conv_w, conv_b, ln_gamma, ln_beta,
                                   patch_size=patch, tm=8,
                                   mxu_dtype=jnp.float32)
    out3_f32 = jax.block_until_ready(out3_f32)
    assert jnp.allclose(out3_f32, ref2, atol=1e-4, rtol=1e-4)

    print("KERNEL_OK")
</pallas_src>

<mosaic_0001>
module attributes {stable_mosaic.version = 11 : i64} {
  func.func @_patch_embed_ln_kernel(%arg0: i32, %arg1: memref<8x256xbf16, #tpu.memory_space<vmem>>, %arg2: memref<256x32xbf16, #tpu.memory_space<vmem>>, %arg3: memref<1x32xf32, #tpu.memory_space<vmem>>, %arg4: memref<1x32xf32, #tpu.memory_space<vmem>>, %arg5: memref<1x32xf32, #tpu.memory_space<vmem>>, %arg6: memref<8x32xbf16, #tpu.memory_space<vmem>>) attributes {dimension_semantics = [#tpu.dimension_semantics<parallel>], iteration_bounds = array<i64: 1>, scalar_prefetch = 0 : i64, scratch_operands = 0 : i64, tpu.core_type = #tpu.core_type<tc>, window_params = [{transform_indices = @transform_0, window_bounds = array<i64: 8, 256>}, {pipeline_mode = #tpu.pipeline_mode<synchronous>, transform_indices = @transform_1, window_bounds = array<i64: 256, 32>}, {pipeline_mode = #tpu.pipeline_mode<synchronous>, transform_indices = @transform_2, window_bounds = array<i64: 1, 32>}, {pipeline_mode = #tpu.pipeline_mode<synchronous>, transform_indices = @transform_3, window_bounds = array<i64: 1, 32>}, {pipeline_mode = #tpu.pipeline_mode<synchronous>, transform_indices = @transform_4, window_bounds = array<i64: 1, 32>}, {transform_indices = @transform_5, window_bounds = array<i64: 8, 32>}]} {
    %c0 = arith.constant 0 : index
    %c0_0 = arith.constant 0 : index
    %0 = vector.load %arg1[%c0, %c0_0] : memref<8x256xbf16, #tpu.memory_space<vmem>>, vector<8x256xbf16>
    %c0_1 = arith.constant 0 : index
    %c0_2 = arith.constant 0 : index
    %1 = vector.load %arg2[%c0_1, %c0_2] : memref<256x32xbf16, #tpu.memory_space<vmem>>, vector<256x32xbf16>
    %cst = arith.constant dense<0.000000e+00> : vector<8x32xf32>
    %2 = tpu.matmul %0, %1, %cst {dimension_numbers = #tpu.dot_dimension_numbers<[1], [0], [0], [1], [0, 0, 1, 1], [], []>} : vector<8x256xbf16>, vector<256x32xbf16>, vector<8x32xf32> -> vector<8x32xf32>
    %c0_3 = arith.constant 0 : index
    %c0_4 = arith.constant 0 : index
    %3 = vector.load %arg3[%c0_3, %c0_4] : memref<1x32xf32, #tpu.memory_space<vmem>>, vector<1x32xf32>
    %4 = vector.broadcast %3 : vector<1x32xf32> to vector<8x32xf32>
    %5 = arith.addf %2, %4 : vector<8x32xf32>
    %cst_5 = arith.constant dense<0.000000e+00> : vector<8xf32>
    %6 = vector.multi_reduction <add>, %5, %cst_5 [1] : vector<8x32xf32> to vector<8xf32>
    %7 = vector.shape_cast %6 : vector<8xf32> to vector<8x1xf32>
    %cst_6 = arith.constant 3.200000e+01 : f32
    %8 = vector.broadcast %cst_6 : f32 to vector<8x1xf32>
    %9 = arith.divf %7, %8 : vector<8x1xf32>
    %10 = arith.mulf %5, %5 : vector<8x32xf32>
    %cst_7 = arith.constant dense<0.000000e+00> : vector<8xf32>
    %11 = vector.multi_reduction <add>, %10, %cst_7 [1] : vector<8x32xf32> to vector<8xf32>
    %12 = vector.shape_cast %11 : vector<8xf32> to vector<8x1xf32>
    %cst_8 = arith.constant 3.200000e+01 : f32
    %13 = vector.broadcast %cst_8 : f32 to vector<8x1xf32>
    %14 = arith.divf %12, %13 : vector<8x1xf32>
    %15 = arith.mulf %9, %9 : vector<8x1xf32>
    %16 = arith.subf %14, %15 : vector<8x1xf32>
    %cst_9 = arith.constant 9.99999974E-6 : f32
    %17 = vector.broadcast %cst_9 : f32 to vector<8x1xf32>
    %18 = arith.addf %16, %17 : vector<8x1xf32>
    %19 = math.rsqrt %18 : vector<8x1xf32>
    %20 = vector.broadcast %9 : vector<8x1xf32> to vector<8x32xf32>
    %21 = arith.subf %5, %20 : vector<8x32xf32>
    %22 = vector.broadcast %19 : vector<8x1xf32> to vector<8x32xf32>
    %23 = arith.mulf %21, %22 : vector<8x32xf32>
    %c0_10 = arith.constant 0 : index
    %c0_11 = arith.constant 0 : index
    %24 = vector.load %arg4[%c0_10, %c0_11] : memref<1x32xf32, #tpu.memory_space<vmem>>, vector<1x32xf32>
    %25 = vector.broadcast %24 : vector<1x32xf32> to vector<8x32xf32>
    %26 = arith.mulf %23, %25 : vector<8x32xf32>
    %c0_12 = arith.constant 0 : index
    %c0_13 = arith.constant 0 : index
    %27 = vector.load %arg5[%c0_12, %c0_13] : memref<1x32xf32, #tpu.memory_space<vmem>>, vector<1x32xf32>
    %28 = vector.broadcast %27 : vector<1x32xf32> to vector<8x32xf32>
    %29 = arith.addf %26, %28 : vector<8x32xf32>
    %30 = arith.truncf %29 : vector<8x32xf32> to vector<8x32xbf16>
    %c0_14 = arith.constant 0 : index
    %c0_15 = arith.constant 0 : index
    %31 = vector.load %arg6[%c0_14, %c0_15] : memref<8x32xbf16, #tpu.memory_space<vmem>>, vector<8x32xbf16>
    tpu.vector_store %arg6[%c0_14, %c0_15], %30 {strides = array<i32>} : memref<8x32xbf16, #tpu.memory_space<vmem>>, vector<8x32xbf16>,
    return
  }
  func.func @transform_0(%arg0: i32) -> (i32, i32) {
    %c0_i32 = arith.constant 0 : i32
    %c0_i32_0 = arith.constant 0 : i32
    return %arg0, %c0_i32 : i32, i32
  }
  func.func @transform_1(%arg0: i32) -> (i32, i32) {
    %c0_i32 = arith.constant 0 : i32
    %c0_i32_0 = arith.constant 0 : i32
    %c0_i32_1 = arith.constant 0 : i32
    return %c0_i32, %c0_i32_0 : i32, i32
  }
  func.func @transform_2(%arg0: i32) -> (i32, i32) {
    %c0_i32 = arith.constant 0 : i32
    %c0_i32_0 = arith.constant 0 : i32
    %c0_i32_1 = arith.constant 0 : i32
    return %c0_i32, %c0_i32_0 : i32, i32
  }
  func.func @transform_3(%arg0: i32) -> (i32, i32) {
    %c0_i32 = arith.constant 0 : i32
    %c0_i32_0 = arith.constant 0 : i32
    %c0_i32_1 = arith.constant 0 : i32
    return %c0_i32, %c0_i32_0 : i32, i32
  }
  func.func @transform_4(%arg0: i32) -> (i32, i32) {
    %c0_i32 = arith.constant 0 : i32
    %c0_i32_0 = arith.constant 0 : i32
    %c0_i32_1 = arith.constant 0 : i32
    return %c0_i32, %c0_i32_0 : i32, i32
  }
  func.func @transform_5(%arg0: i32) -> (i32, i32) {
    %c0_i32 = arith.constant 0 : i32
    %c0_i32_0 = arith.constant 0 : i32
    return %arg0, %c0_i32 : i32, i32
  }
}

</mosaic_0001>

<bundles_post_ra>
// kernel: patch_embed_generic.1
= control target key start
LH: loop header
LB: loop body
LE: loop exit
PB: predicated region body
PF: predicated region fallthrough
CT: control target
= control target key end

     0   :  { %s435_s0 = inlined_call_operand.vmem [shape: bf16[8,256], index: 0, kind: input, shape index: {}]   ;;  %s436_s1 = inlined_call_operand.vmem [shape: bf16[256,32], index: 1, kind: input, shape index: {}]   ;;  %s437_s2 = inlined_call_operand.vmem [shape: f32[1,32], index: 2, kind: input, shape index: {}]   ;;  %s438_s3 = inlined_call_operand.vmem [shape: f32[1,32], index: 3, kind: input, shape index: {}]   ;;  %s439_s4 = inlined_call_operand.vmem [shape: f32[1,32], index: 4, kind: input, shape index: {}]   ;;  %s440_s5 = inlined_call_operand.hbm [shape: bf16[8,32], index: 5, kind: output, shape index: {}]  }
   0x1   :  { %v299_v0 = vld [vmem:[%s436_s1 + $0x78] sm:$0xff]   ;;  %v301_v2 = vld [vmem:[%s436_s1 + $0x70] sm:$0xff]   ;;  %v303_v4 = vld [vmem:[%s436_s1 + $0x68] sm:$0xff]  }
   0x2   :  { %v300_v1 = vld [vmem:[%s436_s1 + $0x38] sm:$0xff]   ;;  %276 = vmatprep.subr.bf16.mxu0 %v299_v0  ;;  %v302_v3 = vld [vmem:[%s436_s1 + $0x30] sm:$0xff]   ;;  %v304_v5 = vld [vmem:[%s436_s1 + $0x28] sm:$0xff]  }
   0x3   :  { %277 = vmatpush3.bf16.msra.mxu0 %v300_v1  ;;  %v305_v6 = vld [vmem:[%s436_s1 + $0x60] sm:$0xff]   ;;  %v307_v8 = vld [vmem:[%s436_s1 + $0x58] sm:$0xff]   ;;  %v309_v10 = vld [vmem:[%s436_s1 + $0x50] sm:$0xff]  }
   0x4   :  { %278 = vmatprep.subr.bf16.mxu0 %v301_v2  ;;  %v306_v7 = vld [vmem:[%s436_s1 + $0x20] sm:$0xff]   ;;  %v308_v9 = vld [vmem:[%s436_s1 + $0x18] sm:$0xff]  }
   0x5   :  { %v22_v11 = vld [vmem:[%s435_s0] sm:$0xff] }
   0x7   :  { %279 = vmatpush3.bf16.msra.mxu0 %v302_v3 }
   0x8   :  { %280 = vmatprep.subr.bf16.mxu0 %v303_v4 }
   0xb   :  { %281 = vmatpush3.bf16.msra.mxu0 %v304_v5 }
   0xc   :  { %282 = vmatprep.subr.bf16.mxu0 %v305_v6 }
   0xf   :  { %283 = vmatpush3.bf16.msra.mxu0 %v306_v7 }
  0x10   :  { %284 = vmatprep.subr.bf16.mxu0 %v307_v8 }
  0x11   :  { %10 = vsyncpa [#allocation3], 0  ;;  %v257_v12 = vcombine.high %v22_v11, %v22_v11  ;;  %v310_v13 = vld [vmem:[%s436_s1 + $0x10] sm:$0xff]   ;;  %v311_v14 = vld [vmem:[%s436_s1 + $0x48] sm:$0xff]   ;;  %v256_v18 = vcombine.low %v22_v11, %v22_v11  ;;  %vm205_vm0 = vcmask 261120   ;;  %s341_s30 = smov [#allocation2]  }
  0x12   :  { %v312_v15 = vld [vmem:[%s436_s1 + $0x8] sm:$0xff]   ;;  %v313_v16 = vld [vmem:[%s436_s1 + $0x40] sm:$0xff]   ;;  %s247_s6 = sshll.u32 %s341_s30, 4  ;;  %vm239_vm1 = vcmask 257024   ;;  %s248_s6 = int_to_ptr.vmem [resolvable:$true] %s247_s6 }
  0x13   :  { %285 = vmatpush3.bf16.msra.mxu0 %v308_v9  ;;  %197 = vmatprep.mubr.bf16.mxu0 %v257_v12  ;;  %v314_v17 = vld [vmem:[%s436_s1] sm:$0xff]   ;;  %s319_s7 = scalar_lea.vmem %s248_s6, 64  ;;  %p324_p1 = scmp.lt.s32.totalorder %s248_s6, %s248_s6 }
  0x14   :  { %286 = vmatprep.subr.bf16.mxu0 %v309_v10  ;;  %v255_v20 = vld [vmem:[%s437_s2] ss:$0 sm:$0xff]  ;;  %p320_p0 = scmp.ne.s32.totalorder %s248_s6, %s319_s7  ;;  %p325_p2 = scmp.lt.s32.totalorder %s319_s7, %s319_s7 }
  0x15   :  { %v274_v38 = vld [vmem:[%s438_s3] ss:$0 sm:$0xff] }
  0x16   :  { %v275_v40 = vld [vmem:[%s439_s4] ss:$0 sm:$0xff]  ;;  %p326_p3 = por %p325_p2, %p324_p1 }
  0x17   :  { %287 = vmatpush3.bf16.msra.mxu0 %v310_v13 }
  0x18   :  { %288 = vmatprep.subr.bf16.mxu0 %v311_v14  ;;  %p327_p4 = pnand %p326_p3, %p320_p0 }
  0x1b   :  { %289 = vmatpush3.bf16.msra.mxu0 %v312_v15 }
  0x1c   :  { %290 = vmatprep.subr.bf16.mxu0 %v313_v16 }
  0x1f   :  { %291 = vmatpush3.bf16.msra.mxu0 %v314_v17 }
  0x22   :  { %198 = vmatmul.mubr.bf16.vlgmr.msra.gmra.mxu0 %v256_v18 }
  0xe2   :  { %v292_v19 = vpop.f32.mrf.mxu0 }
  0xe4   :  { %v293_v21 = vpop.f32.mrf.mxu0 }
  0xe5   :  { %v294_v22 = vadd.f32 %v293_v21, %v292_v19 }
  0xe6   :  { %v295_v23 = vpop.f32.mrf.mxu0 }
  0xe7   :  { %v200_v24 = vadd.f32 %v294_v22, %v255_v20 }
  0xe8   :  { %v296_v25 = vpop.f32.mrf.mxu0 }
  0xe9   :  { %v206_v26 = vsel %vm205_vm0, %v200_v24, 0.0  ;;  %v211_v27 = vmul.f32 %v200_v24, %v200_v24 }
  0xea   :  { %207 = vadd.xlane.f32.xlu0 %v206_v26 }
  0xeb   :  { %v212_v28 = vsel %vm205_vm0, %v211_v27, 0.0 }
  0xee   :  { %213 = vadd.xlane.f32.xlu0 %v212_v28 }
 0x173   :  { %v208_v29 = vpop.xlane.xlu0 %207 }
 0x174   :  { %v210_v30 = vmul.f32 0.03125, %v208_v29 }
 0x176   :  { %v216_v32 = vmul.f32 %v210_v30, %v210_v30  ;;  %v220_v36 = vsub.f32 %v200_v24, %v210_v30 }
 0x177   :  { %v214_v31 = vpop.xlane.xlu0 %213 }
 0x178   :  { %v215_v33 = vmul.f32 0.03125, %v214_v31 }
 0x17a   :  { %v217_v34 = vsub.f32 %v215_v33, %v216_v32 }
 0x17c   :  { %v218_v35 = vadd.f32 1e-05, %v217_v34 }
 0x17e   :  { %317 = vrsqrt.f32 %v218_v35 }
 0x18b   :  { %v318_v37 = vpop.eup %317 }
 0x18c   :  { %v221_v39 = vmul.f32 %v318_v37, %v220_v36 }
 0x18e   :  { %v229_v41 = vmul.f32 %v274_v38, %v221_v39 }
 0x190   :  { %v237_v42 = vadd.f32 %v275_v40, %v229_v41 }
 0x192   :  { %v238_v43 = vpack.c.bf16 %v237_v42, %v237_v42 }
 0x194   :  { %240 = vst.msk [vmem:[#allocation2] sm:$0xf] %vm239_vm1, %v238_v43 }
 0x195   :  { %330 = shalt.err (!%p327_p4)
}
 0x196   :  { %250 = dma.vmem_to_hbm [thread:$0]  %s248_s6, 64, %s440_s5, [#allocation3]  }
 0x197   :  { %339 = dma.done.wait [#allocation3], 64  }
 0x198   :  { %340 = vsyncadd [#allocation3], 4294967232 }
 0x199   :  { %254 = vsyncpa [#allocation3], 1 }

</bundles_post_ra>
